<compile_context>
chip_gen: v6e
topology: v6e:2x2x1
jax: 0.10.0
libtpu: 0.0.40
codegen_flags: <defaults>
</compile_context>

<pallas_src>
import functools

import jax
import jax.numpy as jnp
from jax import lax
from jax.experimental import pallas as pl
from jax.experimental.pallas import tpu as pltpu

BERT_HID = 1024
POS_DIM = 25
STATIC_K = POS_DIM + 2 * BERT_HID      # token-static input width (pos | cls | word)
NEG_INF = -1e9


def _round_up(n, m):
    return (n + m - 1) // m * m


# ---------------------------------------------------------------------------
# Kernel 1: batched static projection  Y = X @ W + b   (bf16 in, f32 out)
# ---------------------------------------------------------------------------
def _linear_kernel(x_ref, w_ref, b_ref, o_ref):
    o_ref[...] = (jnp.dot(x_ref[...], w_ref[...],
                          preferred_element_type=jnp.float32) + b_ref[...])


def pallas_linear(x, w, b, *, tm=8):
    m, k = x.shape
    _, n = w.shape
    assert m % tm == 0
    return pl.pallas_call(
        _linear_kernel,
        grid=(m // tm,),
        out_shape=jax.ShapeDtypeStruct((m, n), jnp.float32),
        in_specs=[pl.BlockSpec((tm, k), lambda i: (i, 0)),
                  pl.BlockSpec((k, n), lambda i: (0, 0)),    # W stays VMEM resident
                  pl.BlockSpec((1, n), lambda i: (0, 0))],
        out_specs=pl.BlockSpec((tm, n), lambda i: (i, 0)),
        compiler_params=pltpu.CompilerParams(
            dimension_semantics=("parallel",)),
    )(x, w, b)


# ---------------------------------------------------------------------------
# Kernel 2: fused per-sentence recurrence (grid = (sentence_len,))
# ---------------------------------------------------------------------------
def _fused_forward_kernel(training, dropout_p, use_preopt, use_preopin, ner, L,
                          # scalar (SMEM) inputs
                          seed_ref, preopt_ref, preopin_ref,
                          # VMEM inputs
                          top_static_ref, bot_static_ref,
                          asp_tab_ref, op_tab_ref,
                          w1t_mem_ref, w2t_ref, b2t_ref,
                          w1b_mem_ref, w1b_tgt_ref, w2b_ref, b2b_ref,
                          t2t_w_ref, t2t_b_ref, t2b_w_ref, t2b_b_ref,
                          bot2top_w_ref, bot2top_b_ref,
                          # outputs (SMEM)
                          top_act_ref, top_prob_ref,
                          bot_act_ref, bot_prob_ref, bot_taken_ref,
                          # scratch
                          mem_ref, asp_ref):
    x = pl.program_id(0)
    cp = b2t_ref.shape[-1]
    lane = lax.broadcasted_iota(jnp.int32, (1, cp), 1)

    @pl.when(x == 0)
    def _init():
        mem_ref[...] = jnp.zeros_like(mem_ref)
        asp_ref[0] = jnp.int32(0)

    use_rng = training and (dropout_p > 0.0 or not use_preopt)
    if use_rng:
        # one hardware-PRNG stream per token; base seed changes per forward()
        pltpu.prng_seed(seed_ref[0] + x)

    def uniform(shape):
        bits = pltpu.bitcast(pltpu.prng_random_bits(shape), jnp.int32)
        return (bits & 0x7FFFFF).astype(jnp.float32) * (1.0 / (1 << 23))

    def maybe_dropout(h):
        if not (training and dropout_p > 0.0):
            return h
        keep = uniform(h.shape) >= dropout_p
        return jnp.where(keep, h * (1.0 / (1.0 - dropout_p)), 0.0)

    def softmax_row(logits):
        m = jnp.max(logits, axis=-1, keepdims=True)
        e = jnp.exp(logits - m)
        return e * pl.reciprocal(jnp.sum(e, axis=-1, keepdims=True), approx=True)

    def argmax_row(v):            # (1, cp) -> scalar int32 (first max)
        return jnp.min(jnp.where(v == jnp.max(v), lane, cp)).astype(jnp.int32)

    def pick(v, idx):             # v[0, idx] as a scalar
        return jnp.sum(jnp.where(lane == idx, v, 0.0))

    def sample_cat(logits):       # Gumbel-max == categorical(softmax(logits))
        u = jnp.maximum(uniform(logits.shape), 1e-7)
        return argmax_row(logits - jnp.log(-jnp.log(u)))

    def row_select(tab, idx):     # tab[idx] as (1, width), no dynamic slicing
        rows = lax.broadcasted_iota(jnp.int32, tab.shape, 0)
        return jnp.sum(jnp.where(rows == idx, tab, 0.0), axis=0, keepdims=True)

    # ---------------- top (aspect) step for token x -------------------------
    pre = (top_static_ref[...]
           + row_select(asp_tab_ref[...], asp_ref[0])
           + jnp.dot(mem_ref[...], w1t_mem_ref[...],
                     preferred_element_type=jnp.float32))
    h = maybe_dropout(jnp.tanh(pre))
    mem_ref[...] = h
    logits = jnp.dot(h, w2t_ref[...], preferred_element_type=jnp.float32) + b2t_ref[...]
    prob = softmax_row(logits)

    if not training:
        action = argmax_row(prob)
    elif use_preopt:
        action = preopt_ref[x]
    else:
        action = sample_cat(logits)

    top_act_ref[x] = action
    top_prob_ref[x] = pick(prob, action)
    asp_ref[0] = jnp.where(action != 0, action, asp_ref[0])

    # ---------------- bot (opinion) branch ----------------------------------
    if ner:
        do_bot = action > 1
        bot_taken_ref[x] = do_bot.astype(jnp.int32)

        @pl.when(do_bot)
        def _bot_branch():
            mem_top = mem_ref[...]
            target = (jnp.dot(mem_top, t2t_w_ref[...],
                              preferred_element_type=jnp.float32) + t2t_b_ref[...])
            mem0 = (jnp.dot(mem_top, t2b_w_ref[...],
                            preferred_element_type=jnp.float32) + t2b_b_ref[...])
            tgt_contrib = jnp.dot(target, w1b_tgt_ref[...],
                                  preferred_element_type=jnp.float32)
            bot_static = bot_static_ref[...]
            op_tab = op_tab_ref[...]

            def body(y, carry):
                mem_b, act_prev = carry
                pre_b = (row_select(bot_static, y)
                         + row_select(op_tab, act_prev)
                         + tgt_contrib
                         + jnp.dot(mem_b, w1b_mem_ref[...],
                                   preferred_element_type=jnp.float32))
                h_b = maybe_dropout(jnp.tanh(pre_b))
                logits_b = (jnp.dot(h_b, w2b_ref[...],
                                    preferred_element_type=jnp.float32) + b2b_ref[...])
                prob_b = softmax_row(logits_b)
                if not training:
                    a_b = argmax_row(prob_b)
                elif use_preopin:
                    a_b = preopin_ref[x * L + y]
                else:
                    a_b = sample_cat(logits_b)
                bot_act_ref[x * L + y] = a_b
                bot_prob_ref[x * L + y] = pick(prob_b, a_b)
                return h_b, a_b

            mem_fin, _ = lax.fori_loop(0, L, body, (mem0, jnp.int32(0)),
                                       unroll=(L <= 16))
            mem_ref[...] = (jnp.dot(mem_fin, bot2top_w_ref[...],
                                    preferred_element_type=jnp.float32)
                            + bot2top_b_ref[...])
    else:
        bot_taken_ref[x] = jnp.int32(0)


def _const_spec(shape):
    return pl.BlockSpec(shape, lambda *_: (0,) * len(shape))


def _run_fused(params, top_static, bot_static, seed, preopt, preopin, *,
               training, ner, use_preopt, use_preopin, dropout_p, L):
    lpad, sp = bot_static.shape[1], bot_static.shape[2]
    cp = params["b2t"].shape[-1]
    kernel = functools.partial(_fused_forward_kernel, training, dropout_p,
                               use_preopt, use_preopin, ner, L)
    smem = lambda: pl.BlockSpec(memory_space=pltpu.MemorySpace.SMEM)
    in_specs = [
        smem(), smem(), smem(),                               # seed, preopt, preopin
        pl.BlockSpec((None, 1, sp), lambda x: (x, 0, 0)),     # top_static row of token x
        pl.BlockSpec((None, lpad, sp), lambda x: (x, 0, 0)),  # bot_static slab of token x
        _const_spec((8, sp)), _const_spec((8, sp)),           # asp_tab, op_tab
        _const_spec((sp, sp)), _const_spec((sp, cp)), _const_spec((1, cp)),
        _const_spec((sp, sp)), _const_spec((sp, sp)),
        _const_spec((sp, cp)), _const_spec((1, cp)),
        _const_spec((sp, sp)), _const_spec((1, sp)),
        _const_spec((sp, sp)), _const_spec((1, sp)),
        _const_spec((sp, sp)), _const_spec((1, sp)),
    ]
    out_shape = (
        jax.ShapeDtypeStruct((L,), jnp.int32),        # top action
        jax.ShapeDtypeStruct((L,), jnp.float32),      # top action prob
        jax.ShapeDtypeStruct((L * L,), jnp.int32),    # bot actions (x*L+y)
        jax.ShapeDtypeStruct((L * L,), jnp.float32),  # bot action probs
        jax.ShapeDtypeStruct((L,), jnp.int32),        # bot branch taken flag
    )
    out_specs = (smem(), smem(), smem(), smem(), smem())
    return pl.pallas_call(
        kernel,
        grid=(L,),
        out_shape=out_shape,
        in_specs=in_specs,
        out_specs=out_specs,
        scratch_shapes=[pltpu.VMEM((1, sp), jnp.float32),   # recurrent memory
                        pltpu.SMEM((1,), jnp.int32)],        # current aspect action
        compiler_params=pltpu.CompilerParams(
            dimension_semantics=("arbitrary",)),             # sequential recurrence
    )(seed, preopt, preopin,
      top_static, bot_static, params["asp_tab"], params["op_tab"],
      params["w1t_mem"], params["w2t"], params["b2t"],
      params["w1b_mem"], params["w1b_tgt"], params["w2b"], params["b2b"],
      params["top2target_w"], params["top2target_b"],
      params["top2bot_w"], params["top2bot_b"],
      params["bot2top_w"], params["bot2top_b"])


# ---------------------------------------------------------------------------
# Host-side glue
# ---------------------------------------------------------------------------
def _build_statics(params, posvs, top_cls, wordintop, bot_cls_all, wordinbot_all, L):
    """Token-invariant part of both MLPs, hoisted into two batched matmuls."""
    sp = params["b1t"].shape[-1]
    kpad = params["wt_static"].shape[0]
    lpad = _round_up(L, 8)

    x_top = jnp.concatenate(
        [posvs.astype(jnp.bfloat16),
         jnp.broadcast_to(top_cls, (L, BERT_HID)),
         wordintop], axis=1)
    x_top = jnp.pad(x_top, ((0, lpad - L), (0, kpad - STATIC_K)))
    top_static = pallas_linear(x_top, params["wt_static"], params["b1t"])[:L]
    top_static = top_static.reshape(L, 1, sp)

    m = L * L
    mpad = _round_up(m, 8)
    x_bot = jnp.concatenate(
        [jnp.tile(posvs.astype(jnp.bfloat16), (L, 1)),
         jnp.repeat(bot_cls_all, L, axis=0),
         wordinbot_all.reshape(m, BERT_HID)], axis=1)
    x_bot = jnp.pad(x_bot, ((0, mpad - m), (0, kpad - STATIC_K)))
    bot_static = pallas_linear(x_bot, params["wb_static"], params["b1b"])[:m]
    bot_static = bot_static.reshape(L, L, sp)
    bot_static = jnp.pad(bot_static, ((0, 0), (0, lpad - L), (0, 0)))
    return top_static, bot_static


@functools.partial(jax.jit, static_argnames=("training", "ner", "use_preopt",
                                              "use_preopin", "dropout_p", "L"))
def _forward_device(params, posvs, top_cls, wordintop, bot_cls_all, wordinbot_all,
                    preopt, preopin, seed, *, training, ner, use_preopt,
                    use_preopin, dropout_p, L):
    top_static, bot_static = _build_statics(params, posvs, top_cls, wordintop,
                                            bot_cls_all, wordinbot_all, L)
    return _run_fused(params, top_static, bot_static, seed, preopt, preopin,
                      training=training, ner=ner, use_preopt=use_preopt,
                      use_preopin=use_preopin, dropout_p=dropout_p, L=L)


def _init_linear(key, fin, fout):
    kw, kb = jax.random.split(key)
    bound = 1.0 / (fin ** 0.5)
    w = jax.random.uniform(kw, (fin, fout), minval=-bound, maxval=bound, dtype=jnp.float32)
    b = jax.random.uniform(kb, (1, fout), minval=-bound, maxval=bound, dtype=jnp.float32)
    return w, b


class Model:
    def __init__(self, lr, dim, statedim, sent_count, dropout, all_pos_tags, key):
        del lr, sent_count
        self.dim = dim
        self.statedim = statedim
        self.aspect_count = 3
        self.opinion_count = 7
        self.dropout = float(dropout)

        self.SP = _round_up(max(statedim, 8), 128)   # lane-dense padded state width
        self.CP = 128                                # lane-dense padded class width
        self.KP = _round_up(STATIC_K, 128)
        sp, cp, s = self.SP, self.CP, statedim

        ks = jax.random.split(key, 12)
        self.top_in = STATIC_K + dim + s
        self.bot_in = STATIC_K + dim + 2 * s

        top_w1, top_b1 = _init_linear(ks[0], self.top_in, s)
        top_w2, top_b2 = _init_linear(ks[1], s, self.aspect_count)
        bot_w1, bot_b1 = _init_linear(ks[2], self.bot_in, s)
        bot_w2, bot_b2 = _init_linear(ks[3], s, self.opinion_count)

        self.posvector = jax.random.normal(ks[4], (len(all_pos_tags), POS_DIM), jnp.float32)
        self.aspectvector = jax.random.normal(ks[5], (self.aspect_count, dim), jnp.float32)
        self.opinionvector = jax.random.normal(ks[6], (self.opinion_count, dim), jnp.float32)

        t2t_w, t2t_b = _init_linear(ks[7], s, s)
        t2b_w, t2b_b = _init_linear(ks[8], s, s)
        b2t_w, b2t_b = _init_linear(ks[9], s, s)
        _ = _init_linear(ks[10], s, s)   # opinion2aspect exists in PyTorch but is unused in forward

        self._bert_key = ks[11]
        self._call_counter = 0

        def pad2(a, r, c):
            return jnp.pad(a, ((0, r - a.shape[0]), (0, c - a.shape[1])))

        k = STATIC_K
        self.params = {
            # token-static W1 slices (bf16) for the batched Pallas matmul
            "wt_static": pad2(top_w1[:k], self.KP, sp).astype(jnp.bfloat16),
            "b1t": pad2(top_b1, 1, sp),
            "wb_static": pad2(bot_w1[:k], self.KP, sp).astype(jnp.bfloat16),
            "b1b": pad2(bot_b1, 1, sp),
            # precomputed embedding @ W1 tables
            "asp_tab": pad2(self.aspectvector @ top_w1[k:k + dim], 8, sp),
            "op_tab": pad2(self.opinionvector @ bot_w1[k:k + dim], 8, sp),
            # recurrent W1 slices + classifier heads (VMEM-resident in the kernel)
            "w1t_mem": pad2(top_w1[k + dim:], sp, sp),
            "w2t": pad2(top_w2, sp, cp),
            "b2t": jnp.full((1, cp), NEG_INF, jnp.float32).at[:, :self.aspect_count].set(top_b2),
            "w1b_mem": pad2(bot_w1[k + dim:k + dim + s], sp, sp),
            "w1b_tgt": pad2(bot_w1[k + dim + s:], sp, sp),
            "w2b": pad2(bot_w2, sp, cp),
            "b2b": jnp.full((1, cp), NEG_INF, jnp.float32).at[:, :self.opinion_count].set(bot_b2),
            "top2target_w": pad2(t2t_w, sp, sp), "top2target_b": pad2(t2t_b, 1, sp),
            "top2bot_w": pad2(t2b_w, sp, sp), "top2bot_b": pad2(t2b_b, 1, sp),
            "bot2top_w": pad2(b2t_w, sp, sp), "bot2top_b": pad2(b2t_b, 1, sp),
        }

    # TODO(synk): synthetic stand-in for BertTokenizer + BertForQuestionAnswering.
    def _fake_bert_all(self, sentence_len):
        L = sentence_len
        top = jax.random.normal(jax.random.fold_in(self._bert_key, 0),
                                (L + 1, BERT_HID), jnp.float32)
        bots = jax.random.normal(jax.random.fold_in(self._bert_key, 1),
                                 (L, L + 1, BERT_HID), jnp.float32)
        return (top[0:1].astype(jnp.bfloat16), top[1:].astype(jnp.bfloat16),
                bots[:, 0, :].astype(jnp.bfloat16), bots[:, 1:, :].astype(jnp.bfloat16))

    def forward(self, mode, pos_tags, sentence_len, preoptions=None,
                pre_opinion_actions=None, seed=None):
        training = 'test' not in mode
        ner = 'NER' in mode
        L = int(sentence_len)
        if seed is None:
            seed = self._call_counter            # fresh dropout/sampling stream per call
        self._call_counter += 1

        posvs = self.posvector[jnp.asarray(pos_tags, jnp.int32)]
        top_cls, wordintop, bot_cls_all, wordinbot_all = self._fake_bert_all(L)

        use_preopt = preoptions is not None
        use_preopin = pre_opinion_actions is not None
        preopt = jnp.asarray(preoptions if use_preopt else [0] * L, jnp.int32)
        preopin = jnp.asarray(pre_opinion_actions if use_preopin
                              else [[0] * L for _ in range(L)], jnp.int32).reshape(L * L)
        seed_arr = jnp.asarray([seed], jnp.int32)

        outs = _forward_device(self.params, posvs, top_cls, wordintop,
                               bot_cls_all, wordinbot_all, preopt, preopin, seed_arr,
                               training=training, ner=ner, use_preopt=use_preopt,
                               use_preopin=use_preopin,
                               dropout_p=self.dropout if training else 0.0, L=L)
        # single device -> host transfer for the whole sentence
        top_act, top_prob, bot_act, bot_prob, bot_taken = jax.device_get(outs)

        top_action = [int(a) for a in top_act]
        # TODO(synk): PyTorch keeps training-mode actprobs as autograd tensors;
        # no autodiff here, so plain floats are returned in both modes.
        top_actprob = [float(p) for p in top_prob]
        bot_act = bot_act.reshape(L, L)
        bot_prob = bot_prob.reshape(L, L)
        bot_opinion_action, bot_opinion_actprob = [], []
        for x in range(L):
            if ner and bot_taken[x]:
                bot_opinion_action.append([int(a) for a in bot_act[x]])
                bot_opinion_actprob.append([float(p) for p in bot_prob[x]])
        return top_action, top_actprob, bot_opinion_action, bot_opinion_actprob


# ---------------------------------------------------------------------------
# Pure-JAX host-loop reference of the fused recurrence (no dropout), for tests
# ---------------------------------------------------------------------------
def _reference_forward(params, top_static, bot_static, *, ner, L,
                       preoptions=None, pre_opinion_actions=None):
    def softmax(v):
        e = jnp.exp(v - jnp.max(v))
        return e / jnp.sum(e)

    sp = top_static.shape[-1]
    mem = jnp.zeros((1, sp), jnp.float32)
    asp = 0
    top_a, top_p, bot_a, bot_p = [], [], [], []
    for x in range(L):
        pre = (top_static[x, 0][None, :] + params["asp_tab"][asp][None, :]
               + mem @ params["w1t_mem"])
        h = jnp.tanh(pre)
        mem = h
        prob = softmax((h @ params["w2t"] + params["b2t"])[0])
        a = int(preoptions[x]) if preoptions is not None else int(jnp.argmax(prob))
        top_a.append(a)
        top_p.append(float(prob[a]))
        if a != 0:
            asp = a
        if ner and a > 1:
            target = mem @ params["top2target_w"] + params["top2target_b"]
            memb = mem @ params["top2bot_w"] + params["top2bot_b"]
            tgt_c = target @ params["w1b_tgt"]
            ab = 0
            accs, accp = [], []
            for y in range(L):
                pre_b = (bot_static[x, y][None, :] + params["op_tab"][ab][None, :]
                         + tgt_c + memb @ params["w1b_mem"])
                hb = jnp.tanh(pre_b)
                memb = hb
                pb = softmax((hb @ params["w2b"] + params["b2b"])[0])
                ab = (int(pre_opinion_actions[x][y]) if pre_opinion_actions is not None
                      else int(jnp.argmax(pb)))
                accs.append(ab)
                accp.append(float(pb[ab]))
            bot_a.append(accs)
            bot_p.append(accp)
            mem = memb @ params["bot2top_w"] + params["bot2top_b"]
    return top_a, top_p, bot_a, bot_p


# ---------------------------------------------------------------------------
if __name__ == "__main__":
    key = jax.random.PRNGKey(0)
    dim, statedim = 16, 32
    all_pos_tags = list(range(10))
    L = 6
    pos_tags = [1, 2, 3, 0, 4, 5]

    model = Model(lr=1e-3, dim=dim, statedim=statedim, sent_count=4, dropout=0.5,
                  all_pos_tags=all_pos_tags, key=key)

    # ---- check 1: batched static-projection kernel vs plain JAX ------------
    kx = jax.random.fold_in(key, 123)
    xa = jax.random.normal(kx, (8, model.KP), jnp.float32).astype(jnp.bfloat16)
    y_pal = pallas_linear(xa, model.params["wt_static"], model.params["b1t"])
    jax.block_until_ready(y_pal)
    y_ref = (jnp.dot(xa, model.params["wt_static"], preferred_element_type=jnp.float32)
             + model.params["b1t"])
    assert jnp.allclose(y_pal, y_ref, atol=2e-3, rtol=2e-3), "linear kernel mismatch"

    # ---- check 2: fused forward (eval / on-device argmax) vs host reference -
    posvs = model.posvector[jnp.asarray(pos_tags, jnp.int32)]
    bert = model._fake_bert_all(L)
    ts, bs = _build_statics(model.params, posvs, *bert, L)
    jax.block_until_ready((ts, bs))
    ref = _reference_forward(model.params, ts, bs, ner=True, L=L)
    out = model.forward('NER_test', pos_tags, L)
    assert out[0] == ref[0], (out[0], ref[0])
    assert all(abs(a - b) < 2e-2 for a, b in zip(out[1], ref[1]))
    assert out[2] == ref[2], (out[2], ref[2])
    for pa, pb in zip(out[3], ref[3]):
        assert all(abs(a - b) < 2e-2 for a, b in zip(pa, pb))

    # ---- check 3: training path with teacher-forced actions (dropout=0) ----
    model0 = Model(lr=1e-3, dim=dim, statedim=statedim, sent_count=4, dropout=0.0,
                   all_pos_tags=all_pos_tags, key=jax.random.fold_in(key, 1))
    preopt = [0, 2, 1, 0, 2, 0]                      # forces the bot branch at x=1,4
    preopin = [[(x + y) % 7 for y in range(L)] for x in range(L)]
    ts0, bs0 = _build_statics(model0.params,
                              model0.posvector[jnp.asarray(pos_tags, jnp.int32)],
                              *model0._fake_bert_all(L), L)
    ref0 = _reference_forward(model0.params, ts0, bs0, ner=True, L=L,
                              preoptions=preopt, pre_opinion_actions=preopin)
    out0 = model0.forward('NER', pos_tags, L, preoptions=preopt,
                          pre_opinion_actions=preopin)
    assert out0[0] == ref0[0], (out0[0], ref0[0])
    assert out0[2] == ref0[2], (out0[2], ref0[2])
    assert all(abs(a - b) < 2e-2 for a, b in zip(out0[1], ref0[1]))
    for pa, pb in zip(out0[3], ref0[3]):
        assert all(abs(a - b) < 2e-2 for a, b in zip(pa, pb))

    print("KERNEL_OK")
</pallas_src>

<mosaic_0001>
module attributes {stable_mosaic.version = 11 : i64} {
  func.func @_linear_kernel(%arg0: i32, %arg1: memref<8x2176xbf16, #tpu.memory_space<vmem>>, %arg2: memref<2176x128xbf16, #tpu.memory_space<vmem>>, %arg3: memref<1x128xf32, #tpu.memory_space<vmem>>, %arg4: memref<8x128xf32, #tpu.memory_space<vmem>>) attributes {dimension_semantics = [#tpu.dimension_semantics<parallel>], iteration_bounds = array<i64: 1>, scalar_prefetch = 0 : i64, scratch_operands = 0 : i64, tpu.core_type = #tpu.core_type<tc>, window_params = [{transform_indices = @transform_0, window_bounds = array<i64: 8, 2176>}, {pipeline_mode = #tpu.pipeline_mode<synchronous>, transform_indices = @transform_1, window_bounds = array<i64: 2176, 128>}, {pipeline_mode = #tpu.pipeline_mode<synchronous>, transform_indices = @transform_2, window_bounds = array<i64: 1, 128>}, {transform_indices = @transform_3, window_bounds = array<i64: 8, 128>}]} {
    %c0 = arith.constant 0 : index
    %c0_0 = arith.constant 0 : index
    %0 = vector.load %arg1[%c0, %c0_0] : memref<8x2176xbf16, #tpu.memory_space<vmem>>, vector<8x2176xbf16>
    %c0_1 = arith.constant 0 : index
    %c0_2 = arith.constant 0 : index
    %1 = vector.load %arg2[%c0_1, %c0_2] : memref<2176x128xbf16, #tpu.memory_space<vmem>>, vector<2176x128xbf16>
    %cst = arith.constant dense<0.000000e+00> : vector<8x128xf32>
    %2 = tpu.matmul %0, %1, %cst {dimension_numbers = #tpu.dot_dimension_numbers<[1], [0], [0], [1], [0, 0, 1, 1], [], []>} : vector<8x2176xbf16>, vector<2176x128xbf16>, vector<8x128xf32> -> vector<8x128xf32>
    %c0_3 = arith.constant 0 : index
    %c0_4 = arith.constant 0 : index
    %3 = vector.load %arg3[%c0_3, %c0_4] : memref<1x128xf32, #tpu.memory_space<vmem>>, vector<1x128xf32>
    %4 = vector.broadcast %3 : vector<1x128xf32> to vector<8x128xf32>
    %5 = arith.addf %2, %4 : vector<8x128xf32>
    %c0_5 = arith.constant 0 : index
    %c0_6 = arith.constant 0 : index
    %6 = vector.load %arg4[%c0_5, %c0_6] : memref<8x128xf32, #tpu.memory_space<vmem>>, vector<8x128xf32>
    tpu.vector_store %arg4[%c0_5, %c0_6], %5 {strides = array<i32>} : memref<8x128xf32, #tpu.memory_space<vmem>>, vector<8x128xf32>,
    return
  }
  func.func @transform_0(%arg0: i32) -> (i32, i32) {
    %c0_i32 = arith.constant 0 : i32
    %c0_i32_0 = arith.constant 0 : i32
    return %arg0, %c0_i32 : i32, i32
  }
  func.func @transform_1(%arg0: i32) -> (i32, i32) {
    %c0_i32 = arith.constant 0 : i32
    %c0_i32_0 = arith.constant 0 : i32
    %c0_i32_1 = arith.constant 0 : i32
    return %c0_i32, %c0_i32_0 : i32, i32
  }
  func.func @transform_2(%arg0: i32) -> (i32, i32) {
    %c0_i32 = arith.constant 0 : i32
    %c0_i32_0 = arith.constant 0 : i32
    %c0_i32_1 = arith.constant 0 : i32
    return %c0_i32, %c0_i32_0 : i32, i32
  }
  func.func @transform_3(%arg0: i32) -> (i32, i32) {
    %c0_i32 = arith.constant 0 : i32
    %c0_i32_0 = arith.constant 0 : i32
    return %arg0, %c0_i32 : i32, i32
  }
}

</mosaic_0001>

<bundles_post_ra>
// kernel: tpu_custom_call.1
= control target key start
LH: loop header
LB: loop body
LE: loop exit
PB: predicated region body
PF: predicated region fallthrough
CT: control target
= control target key end

     0   :  { %8 = vsyncpa [#allocation3], 0  ;;  %s2207_s0 = inlined_call_operand.hbm [shape: bf16[8,2176], index: 0, kind: input, shape index: {}]   ;;  %s2208_s1 = inlined_call_operand.hbm [shape: bf16[2176,128], index: 1, kind: input, shape index: {}]   ;;  %s2209_s2 = inlined_call_operand.vmem [shape: f32[1,128], index: 2, kind: input, shape index: {}]   ;;  %s2210_s3 = inlined_call_operand.hbm [shape: f32[8,128], index: 3, kind: output, shape index: {}]  }
   0x1   :  { %9 = vsyncpa [#allocation6], 0 }
   0x2   :  { %10 = vsyncpa [#allocation4], 0  ;;  %s2168_s12 = smov [#allocation2]   ;;  %s2169_s14 = smov [#allocation5]  }
   0x3   :  { %s17_s13 = sshll.u32 %s2168_s12, 4  ;;  %s26_s15 = sshll.u32 %s2169_s14, 4  ;;  %s18_s13 = int_to_ptr.vmem [resolvable:$true] %s17_s13  ;;  %s27_s15 = int_to_ptr.vmem [resolvable:$true] %s26_s15 }
   0x4   :  { %s2110_s16 = scalar_lea.vmem %s18_s13, 1088  ;;  %p2115_p1 = scmp.lt.s32.totalorder %s18_s13, %s18_s13 }
   0x5   :  { %p2111_p0 = scmp.ne.s32.totalorder %s18_s13, %s2110_s16  ;;  %p2116_p2 = scmp.lt.s32.totalorder %s2110_s16, %s2110_s16 }
   0x7   :  { %p2117_p3 = por %p2116_p2, %p2115_p1 }
   0x9   :  { %p2118_p4 = pnand %p2117_p3, %p2111_p0 }
   0xb   :  { %2121 = shalt.err (!%p2118_p4)
}
   0xc   :  { %20 = dma.hbm_to_vmem [thread:$0]  %s2207_s0, 1088, %s18_s13, [#allocation3]  }
   0xd   :  { %s2130_s19 = scalar_lea.vmem %s27_s15, 17408  ;;  %p2135_p6 = scmp.lt.s32.totalorder %s27_s15, %s27_s15 }
   0xe   :  { %p2131_p5 = scmp.ne.s32.totalorder %s27_s15, %s2130_s19  ;;  %p2136_p7 = scmp.lt.s32.totalorder %s2130_s19, %s2130_s19 }
  0x10   :  { %p2137_p8 = por %p2136_p7, %p2135_p6 }
  0x12   :  { %p2138_p9 = pnand %p2137_p8, %p2131_p5 }
  0x14   :  { %2141 = shalt.err (!%p2138_p9)
}
  0x15   :  { %s2170_s20 = smov 64   ;;  %s2171_s21 = smov 4  }
  0x16   :  { %32 = dma.hbm_to_vmem [thread:$0]  %s2208_s1, 17408, %s27_s15, [#allocation6], %s2170_s20, %s2170_s20, %s2171_s21  }
  0x17   :  { %2162 = dma.done.wait [#allocation3], 1088  }
  0x18   :  { %2163 = vsyncadd [#allocation3], 4294966208 }
  0x19   :  { %2164 = dma.done.wait [#allocation6], 17408  }
  0x1a   :  { %2165 = vsyncadd [#allocation6], 4294949888  ;;  %v1949_v0 = vld [vmem:[#allocation5 + $0x78] sm:$0xff]   ;;  %v1953_v4 = vld [vmem:[#allocation5 + $0x70] sm:$0xff]   ;;  %vm2173_vm0 = vmmov 0  }
  0x1b   :  { %v1950_v1 = vld [vmem:[#allocation5 + $0x38] sm:$0xff]   ;;  %1737 = vmatprep.subr.bf16.mxu0 %v1949_v0  ;;  %v1954_v5 = vld [vmem:[#allocation5 + $0x30] sm:$0xff]   ;;  %v1957_v8 = vld [vmem:[#allocation5 + $0x68] sm:$0xff]  }
  0x1c   :  { %v1951_v2 = vld [vmem:[#allocation5 + $0xf8] sm:$0xff]   ;;  %1738 = vmatpush3.bf16.msra.mxu0 %v1950_v1  ;;  %v1955_v6 = vld [vmem:[#allocation5 + $0xf0] sm:$0xff]   ;;  %v1958_v9 = vld [vmem:[#allocation5 + $0x28] sm:$0xff]  }
  0x1d   :  { %v1952_v3 = vld [vmem:[#allocation5 + $0xb8] sm:$0xff]   ;;  %1759 = vmatprep.subr.bf16.mxu1 %v1951_v2  ;;  %1739 = vmatprep.subr.bf16.mxu0 %v1953_v4  ;;  %v1956_v7 = vld [vmem:[#allocation5 + $0xb0] sm:$0xff]   ;;  %v1959_v10 = vld [vmem:[#allocation5 + $0xe8] sm:$0xff]  }
  0x1e   :  { %1760 = vmatpush3.bf16.msra.mxu1 %v1952_v3  ;;  %v1960_v11 = vld [vmem:[#allocation5 + $0xa8] sm:$0xff]   ;;  %v1961_v12 = vld [vmem:[#allocation5 + $0x60] sm:$0xff]   ;;  %v1965_v16 = vld [vmem:[#allocation5 + $0x58] sm:$0xff]  }
  0x1f   :  { %1761 = vmatprep.subr.bf16.mxu1 %v1955_v6  ;;  %v1962_v13 = vld [vmem:[#allocation5 + $0x20] sm:$0xff]   ;;  %v1966_v17 = vld [vmem:[#allocation5 + $0x18] sm:$0xff]   ;;  %v1969_v20 = vld [vmem:[#allocation5 + $0x50] sm:$0xff]  }
  0x20   :  { %1740 = vmatpush3.bf16.msra.mxu0 %v1954_v5  ;;  %v1963_v14 = vld [vmem:[#allocation5 + $0xe0] sm:$0xff]   ;;  %v1967_v18 = vld [vmem:[#allocation5 + $0xd8] sm:$0xff]   ;;  %v1970_v21 = vld [vmem:[#allocation5 + $0x10] sm:$0xff]  }
  0x21   :  { %1741 = vmatprep.subr.bf16.mxu0 %v1957_v8  ;;  %v1964_v15 = vld [vmem:[#allocation5 + $0xa0] sm:$0xff]   ;;  %v1968_v19 = vld [vmem:[#allocation5 + $0x98] sm:$0xff]   ;;  %v1971_v22 = vld [vmem:[#allocation5 + $0xd0] sm:$0xff]  }
  0x22   :  { %1762 = vmatpush3.bf16.msra.mxu1 %v1956_v7  ;;  %v1972_v23 = vld [vmem:[#allocation5 + $0x90] sm:$0xff]   ;;  %v1973_v24 = vld [vmem:[#allocation5 + $0x48] sm:$0xff]   ;;  %v1977_v28 = vld [vmem:[#allocation5 + $0x40] sm:$0xff]  }
  0x23   :  { %1763 = vmatprep.subr.bf16.mxu1 %v1959_v10  ;;  %v1974_v25 = vld [vmem:[#allocation5 + $0x8] sm:$0xff]   ;;  %v1978_v29 = vld [vmem:[#allocation5] sm:$0xff]   ;;  %v1983_v35 = vld [vmem:[#allocation5 + $0x178] sm:$0xff]  }
  0x24   :  { %1742 = vmatpush3.bf16.msra.mxu0 %v1958_v9  ;;  %v1975_v26 = vld [vmem:[#allocation5 + $0xc8] sm:$0xff]   ;;  %v1979_v30 = vld [vmem:[#allocation5 + $0xc0] sm:$0xff]   ;;  %v1986_v39 = vld [vmem:[#allocation5 + $0x138] sm:$0xff]  }
  0x25   :  { %1743 = vmatprep.subr.bf16.mxu0 %v1961_v12  ;;  %v1976_v27 = vld [vmem:[#allocation5 + $0x88] sm:$0xff]   ;;  %v42_v31 = vld [vmem:[#allocation2] sm:$0xff]  ;;  %v1989_v42 = vld [vmem:[#allocation5 + $0x170] sm:$0xff]  }
  0x26   :  { %1764 = vmatpush3.bf16.msra.mxu1 %v1960_v11  ;;  %v1584_v32 = vcombine.low %v42_v31, %v42_v31  ;;  %v1585_v33 = vcombine.high %v42_v31, %v42_v31  ;;  %v1982_v34 = vld [vmem:[#allocation5 + $0x80] sm:$0xff]   ;;  %v1987_v40 = vld [vmem:[#allocation5 + $0x1f8] sm:$0xff]   ;;  %v1990_v43 = vld [vmem:[#allocation5 + $0x130] sm:$0xff]  }
  0x27   :  { %1765 = vmatprep.subr.bf16.mxu1 %v1963_v14  ;;  %v43_v36 = vld [vmem:[#allocation2 + $0x8] sm:$0xff]  ;;  %v1988_v41 = vld [vmem:[#allocation5 + $0x1b8] sm:$0xff]   ;;  %v1991_v44 = vld [vmem:[#allocation5 + $0x1f0] sm:$0xff]  }
  0x28   :  { %1744 = vmatpush3.bf16.msra.mxu0 %v1962_v13  ;;  %1238 = vmatprep.mubr.bf16.mxu0 %v1585_v33  ;;  %v1586_v37 = vcombine.low %v43_v36, %v43_v36  ;;  %v1587_v38 = vcombine.high %v43_v36, %v43_v36  ;;  %v1992_v45 = vld [vmem:[#allocation5 + $0x1b0] sm:$0xff]   ;;  %v1993_v46 = vld [vmem:[#allocation5 + $0x168] sm:$0xff]   ;;  %v1997_v50 = vld [vmem:[#allocation5 + $0x160] sm:$0xff]  }
  0x29   :  { %1745 = vmatprep.subr.bf16.mxu0 %v1965_v16  ;;  %v1994_v47 = vld [vmem:[#allocation5 + $0x128] sm:$0xff]   ;;  %v1998_v51 = vld [vmem:[#allocation5 + $0x120] sm:$0xff]   ;;  %v2001_v54 = vld [vmem:[#allocation5 + $0x158] sm:$0xff]  }
  0x2a   :  { %1766 = vmatpush3.bf16.msra.mxu1 %v1964_v15  ;;  %1278 = vmatprep.mubr.bf16.mxu1 %v1587_v38  ;;  %v1995_v48 = vld [vmem:[#allocation5 + $0x1e8] sm:$0xff]   ;;  %v1999_v52 = vld [vmem:[#allocation5 + $0x1e0] sm:$0xff]   ;;  %v2002_v55 = vld [vmem:[#allocation5 + $0x118] sm:$0xff]  }
  0x2b   :  { %1767 = vmatprep.subr.bf16.mxu1 %v1967_v18  ;;  %v1996_v49 = vld [vmem:[#allocation5 + $0x1a8] sm:$0xff]   ;;  %v2000_v53 = vld [vmem:[#allocation5 + $0x1a0] sm:$0xff]   ;;  %v2003_v56 = vld [vmem:[#allocation5 + $0x1d8] sm:$0xff]  }
  0x2c   :  { %1746 = vmatpush3.bf16.msra.mxu0 %v1966_v17  ;;  %v2004_v57 = vld [vmem:[#allocation5 + $0x198] sm:$0xff]   ;;  %v2005_v58 = vld [vmem:[#allocation5 + $0x150] sm:$0xff]   ;;  %v2009_v62 = vld [vmem:[#allocation5 + $0x148] sm:$0xff]  }
  0x2d   :  { %1747 = vmatprep.subr.bf16.mxu0 %v1969_v20  ;;  %v2006_v59 = vld [vmem:[#allocation5 + $0x110] sm:$0xff]   ;;  %v2010_v63 = vld [vmem:[#allocation5 + $0x108] sm:$0xff]   ;;  %v2013_v2 = vld [vmem:[#allocation5 + $0x140] sm:$0xff]  }
  0x2e   :  { %1768 = vmatpush3.bf16.msra.mxu1 %v1968_v19  ;;  %v2007_v60 = vld [vmem:[#allocation5 + $0x1d0] sm:$0xff]   ;;  %v2011_v0 = vld [vmem:[#allocation5 + $0x1c8] sm:$0xff]   ;;  %v2014_v3 = vld [vmem:[#allocation5 + $0x100] sm:$0xff]  }
  0x2f   :  { %1769 = vmatprep.subr.bf16.mxu1 %v1971_v22  ;;  %v2008_v61 = vld [vmem:[#allocation5 + $0x190] sm:$0xff]   ;;  %v2012_v1 = vld [vmem:[#allocation5 + $0x188] sm:$0xff]   ;;  %v2015_v4 = vld [vmem:[#allocation5 + $0x1c0] sm:$0xff]  }
  0x30   :  { %1748 = vmatpush3.bf16.msra.mxu0 %v1970_v21  ;;  %v44_v5 = vld [vmem:[#allocation2 + $0x10] sm:$0xff]  ;;  %v2018_v8 = vld [vmem:[#allocation5 + $0x180] sm:$0xff]   ;;  %v2019_v9 = vld [vmem:[#allocation5 + $0x278] sm:$0xff]  }
  0x31   :  { %1749 = vmatprep.subr.bf16.mxu0 %v1973_v24  ;;  %v1588_v6 = vcombine.low %v44_v5, %v44_v5  ;;  %v1589_v7 = vcombine.high %v44_v5, %v44_v5  ;;  %v45_v10 = vld [vmem:[#allocation2 + $0x18] sm:$0xff]  ;;  %v2029_v20 = vld [vmem:[#allocation5 + $0x268] sm:$0xff]   ;;  %v2033_v24 = vld [vmem:[#allocation5 + $0x260] sm:$0xff]  }
  0x32   :  { %1770 = vmatpush3.bf16.msra.mxu1 %v1972_v23  ;;  %v1590_v11 = vcombine.low %v45_v10, %v45_v10  ;;  %v1591_v12 = vcombine.high %v45_v10, %v45_v10  ;;  %v2022_v13 = vld [vmem:[#allocation5 + $0x238] sm:$0xff]   ;;  %v2025_v16 = vld [vmem:[#allocation5 + $0x270] sm:$0xff]   ;;  %v2030_v21 = vld [vmem:[#allocation5 + $0x228] sm:$0xff]  }
  0x33   :  { %1771 = vmatprep.subr.bf16.mxu1 %v1975_v26  ;;  %v2023_v14 = vld [vmem:[#allocation5 + $0x2f8] sm:$0xff]   ;;  %v2026_v17 = vld [vmem:[#allocation5 + $0x230] sm:$0xff]   ;;  %v2031_v22 = vld [vmem:[#allocation5 + $0x2e8] sm:$0xff]  }
  0x34   :  { %1750 = vmatpush3.bf16.msra.mxu0 %v1974_v25  ;;  %v2024_v15 = vld [vmem:[#allocation5 + $0x2b8] sm:$0xff]   ;;  %v2027_v18 = vld [vmem:[#allocation5 + $0x2f0] sm:$0xff]   ;;  %v2032_v23 = vld [vmem:[#allocation5 + $0x2a8] sm:$0xff]  }
  0x35   :  { %1751 = vmatprep.subr.bf16.mxu0 %v1977_v28  ;;  %v2028_v19 = vld [vmem:[#allocation5 + $0x2b0] sm:$0xff]   ;;  %v2034_v25 = vld [vmem:[#allocation5 + $0x220] sm:$0xff]   ;;  %v2037_v28 = vld [vmem:[#allocation5 + $0x258] sm:$0xff]  }
  0x36   :  { %1772 = vmatpush3.bf16.msra.mxu1 %v1976_v27  ;;  %v2035_v26 = vld [vmem:[#allocation5 + $0x2e0] sm:$0xff]   ;;  %v2040_v31 = vld [vmem:[#allocation5 + $0x298] sm:$0xff]   ;;  %v2042_v33 = vld [vmem:[#allocation5 + $0x210] sm:$0xff]  }
  0x37   :  { %1773 = vmatprep.subr.bf16.mxu1 %v1979_v30  ;;  %v2036_v27 = vld [vmem:[#allocation5 + $0x2a0] sm:$0xff]   ;;  %v2039_v30 = vld [vmem:[#allocation5 + $0x2d8] sm:$0xff]   ;;  %v2045_v36 = vld [vmem:[#allocation5 + $0x248] sm:$0xff]  }
  0x38   :  { %1752 = vmatpush3.bf16.msra.mxu0 %v1978_v29  ;;  %v2038_v29 = vld [vmem:[#allocation5 + $0x218] sm:$0xff]   ;;  %v2047_v38 = vld [vmem:[#allocation5 + $0x2c8] sm:$0xff]  }
  0x39   :  { %1781 = vmatprep.subr.bf16.mxu0 %v1983_v35  ;;  %v2044_v35 = vld [vmem:[#allocation5 + $0x290] sm:$0xff]   ;;  %v2076_v5 = vld [vmem:[#allocation5 + $0x398] sm:$0xff]   ;;  %v2081_v10 = vld [vmem:[#allocation5 + $0x348] sm:$0xff]  }
  0x3a   :  { %1774 = vmatpush3.bf16.msra.mxu1 %v1982_v34  ;;  %v2043_v34 = vld [vmem:[#allocation5 + $0x2d0] sm:$0xff]  }
  0x3b   :  { %1239 = vmatmul.mubr.bf16.vlgmr.msra.gmra.mxu0 %v1584_v32  ;;  %1803 = vmatprep.subr.bf16.mxu1 %v1987_v40  ;;  %v2041_v32 = vld [vmem:[#allocation5 + $0x250] sm:$0xff]   ;;  %v2049_v40 = vld [vmem:[#allocation5 + $0x240] sm:$0xff]  }
  0x3c   :  { %1782 = vmatpush3.bf16.msra.mxu0 %v1986_v39  ;;  %1318 = vmatprep.mubr.bf16.mxu0 %v1589_v7  ;;  %v2048_v39 = vld [vmem:[#allocation5 + $0x288] sm:$0xff]   ;;  %v2078_v7 = vld [vmem:[#allocation5 + $0x310] sm:$0xff]  }
  0x3d   :  { %1279 = vmatmul.mubr.bf16.vlgmr.msra.gmra.mxu1 %v1586_v37  ;;  %1783 = vmatprep.subr.bf16.mxu0 %v1989_v42  ;;  %v2046_v37 = vld [vmem:[#allocation5 + $0x208] sm:$0xff]   ;;  %v2051_v42 = vld [vmem:[#allocation5 + $0x2c0] sm:$0xff]  }
  0x3e   :  { %1804 = vmatpush3.bf16.msra.mxu1 %v1988_v41  ;;  %1358 = vmatprep.mubr.bf16.mxu1 %v1591_v12  ;;  %v2050_v41 = vld [vmem:[#allocation5 + $0x200] sm:$0xff]   ;;  %v2083_v12 = vld [vmem:[#allocation5 + $0x3c8] sm:$0xff]  }
  0x3f   :  { %1805 = vmatprep.subr.bf16.mxu1 %v1991_v44 }
  0x40   :  { %1784 = vmatpush3.bf16.msra.mxu0 %v1990_v43  ;;  %v46_v43 = vld [vmem:[#allocation2 + $0x20] sm:$0xff] }
  0x41   :  { %1785 = vmatprep.subr.bf16.mxu0 %v1993_v46  ;;  %v1592_v44 = vcombine.low %v46_v43, %v46_v43  ;;  %v2054_v46 = vld [vmem:[#allocation5 + $0x280] sm:$0xff]  }
  0x42   :  { %1806 = vmatpush3.bf16.msra.mxu1 %v1992_v45  ;;  %v1593_v45 = vcombine.high %v46_v43, %v46_v43 }
  0x43   :  { %1807 = vmatprep.subr.bf16.mxu1 %v1995_v48  ;;  %v47_v48 = vld [vmem:[#allocation2 + $0x28] sm:$0xff] }
  0x44   :  { %1786 = vmatpush3.bf16.msra.mxu0 %v1994_v47  ;;  %v2055_v47 = vld [vmem:[#allocation5 + $0x378] sm:$0xff]  }
  0x45   :  { %1787 = vmatprep.subr.bf16.mxu0 %v1997_v50  ;;  %v1595_v50 = vcombine.high %v47_v48, %v47_v48 }
  0x46   :  { %1808 = vmatpush3.bf16.msra.mxu1 %v1996_v49  ;;  %v1594_v49 = vcombine.low %v47_v48, %v47_v48 }
  0x47   :  { %1809 = vmatprep.subr.bf16.mxu1 %v1999_v52  ;;  %v2059_v52 = vld [vmem:[#allocation5 + $0x3f8] sm:$0xff]  }
  0x48   :  { %1788 = vmatpush3.bf16.msra.mxu0 %v1998_v51  ;;  %v2058_v51 = vld [vmem:[#allocation5 + $0x338] sm:$0xff]  }
  0x49   :  { %1789 = vmatprep.subr.bf16.mxu0 %v2001_v54  ;;  %v2061_v54 = vld [vmem:[#allocation5 + $0x370] sm:$0xff]  }
  0x4a   :  { %1810 = vmatpush3.bf16.msra.mxu1 %v2000_v53  ;;  %v2060_v53 = vld [vmem:[#allocation5 + $0x3b8] sm:$0xff]  }
  0x4b   :  { %1811 = vmatprep.subr.bf16.mxu1 %v2003_v56  ;;  %v2063_v56 = vld [vmem:[#allocation5 + $0x3f0] sm:$0xff]  }
  0x4c   :  { %1790 = vmatpush3.bf16.msra.mxu0 %v2002_v55  ;;  %v2062_v55 = vld [vmem:[#allocation5 + $0x330] sm:$0xff]  }
  0x4d   :  { %1791 = vmatprep.subr.bf16.mxu0 %v2005_v58  ;;  %v2065_v58 = vld [vmem:[#allocation5 + $0x368] sm:$0xff]  }
  0x4e   :  { %1812 = vmatpush3.bf16.msra.mxu1 %v2004_v57  ;;  %v2064_v57 = vld [vmem:[#allocation5 + $0x3b0] sm:$0xff]  }
  0x4f   :  { %1813 = vmatprep.subr.bf16.mxu1 %v2007_v60  ;;  %v2067_v60 = vld [vmem:[#allocation5 + $0x3e8] sm:$0xff]  }
  0x50   :  { %1792 = vmatpush3.bf16.msra.mxu0 %v2006_v59  ;;  %v2066_v59 = vld [vmem:[#allocation5 + $0x328] sm:$0xff]  }
  0x51   :  { %1793 = vmatprep.subr.bf16.mxu0 %v2009_v62  ;;  %v2069_v62 = vld [vmem:[#allocation5 + $0x360] sm:$0xff]  }
  0x52   :  { %1814 = vmatpush3.bf16.msra.mxu1 %v2008_v61  ;;  %v2068_v61 = vld [vmem:[#allocation5 + $0x3a8] sm:$0xff]  }
  0x53   :  { %1815 = vmatprep.subr.bf16.mxu1 %v2011_v0  ;;  %v2071_v0 = vld [vmem:[#allocation5 + $0x3e0] sm:$0xff]  }
  0x54   :  { %1794 = vmatpush3.bf16.msra.mxu0 %v2010_v63  ;;  %v2070_v63 = vld [vmem:[#allocation5 + $0x320] sm:$0xff]  }
  0x55   :  { %1795 = vmatprep.subr.bf16.mxu0 %v2013_v2  ;;  %v2073_v2 = vld [vmem:[#allocation5 + $0x358] sm:$0xff]  }
  0x56   :  { %1816 = vmatpush3.bf16.msra.mxu1 %v2012_v1  ;;  %v2072_v1 = vld [vmem:[#allocation5 + $0x3a0] sm:$0xff]  }
  0x57   :  { %1817 = vmatprep.subr.bf16.mxu1 %v2015_v4  ;;  %v2075_v4 = vld [vmem:[#allocation5 + $0x3d8] sm:$0xff]  }
  0x58   :  { %1796 = vmatpush3.bf16.msra.mxu0 %v2014_v3  ;;  %v2074_v3 = vld [vmem:[#allocation5 + $0x318] sm:$0xff]  }
  0x59   :  { %1825 = vmatprep.subr.bf16.mxu0 %v2019_v9  ;;  %v2080_v9 = vld [vmem:[#allocation5 + $0x390] sm:$0xff]  }
  0x5a   :  { %1818 = vmatpush3.bf16.msra.mxu1 %v2018_v8  ;;  %v2079_v8 = vld [vmem:[#allocation5 + $0x3d0] sm:$0xff]  }
  0x5b   :  { %1319 = vmatmul.mubr.bf16.vlgmr.msra.gmra.mxu0 %v1588_v6  ;;  %1847 = vmatprep.subr.bf16.mxu1 %v2023_v14  ;;  %v2077_v6 = vld [vmem:[#allocation5 + $0x350] sm:$0xff]   ;;  %v2085_v14 = vld [vmem:[#allocation5 + $0x340] sm:$0xff]  }
  0x5c   :  { %1826 = vmatpush3.bf16.msra.mxu0 %v2022_v13  ;;  %1398 = vmatprep.mubr.bf16.mxu0 %v1593_v45  ;;  %v2084_v13 = vld [vmem:[#allocation5 + $0x388] sm:$0xff]  }
  0x5d   :  { %1359 = vmatmul.mubr.bf16.vlgmr.msra.gmra.mxu1 %v1590_v11  ;;  %1827 = vmatprep.subr.bf16.mxu0 %v2025_v16  ;;  %v2082_v11 = vld [vmem:[#allocation5 + $0x308] sm:$0xff]   ;;  %v2087_v16 = vld [vmem:[#allocation5 + $0x3c0] sm:$0xff]  }
  0x5e   :  { %1848 = vmatpush3.bf16.msra.mxu1 %v2024_v15  ;;  %1438 = vmatprep.mubr.bf16.mxu1 %v1595_v50  ;;  %v2086_v15 = vld [vmem:[#allocation5 + $0x300] sm:$0xff]  }
  0x5f   :  { %1849 = vmatprep.subr.bf16.mxu1 %v2027_v18 }
  0x60   :  { %1828 = vmatpush3.bf16.msra.mxu0 %v2026_v17  ;;  %v48_v17 = vld [vmem:[#allocation2 + $0x30] sm:$0xff] }
  0x61   :  { %1829 = vmatprep.subr.bf16.mxu0 %v2029_v20  ;;  %v1596_v18 = vcombine.low %v48_v17, %v48_v17  ;;  %v2090_v20 = vld [vmem:[#allocation5 + $0x380] sm:$0xff]  }
  0x62   :  { %1850 = vmatpush3.bf16.msra.mxu1 %v2028_v19  ;;  %v1597_v19 = vcombine.high %v48_v17, %v48_v17 }
  0x63   :  { %1851 = vmatprep.subr.bf16.mxu1 %v2031_v22  ;;  %v49_v22 = vld [vmem:[#allocation2 + $0x38] sm:$0xff] }
  0x64   :  { %1830 = vmatpush3.bf16.msra.mxu0 %v2030_v21  ;;  %v2172_v21 = vmov 0.0  }
  0x65   :  { %1831 = vmatprep.subr.bf16.mxu0 %v2033_v24  ;;  %v1599_v24 = vcombine.high %v49_v22, %v49_v22 }
  0x66   :  { %1852 = vmatpush3.bf16.msra.mxu1 %v2032_v23  ;;  %v1598_v23 = vcombine.low %v49_v22, %v49_v22 }
  0x67   :  { %1853 = vmatprep.subr.bf16.mxu1 %v2035_v26  ;;  %v2094_v26 = vld [vmem:[#allocation5 + $0x430] sm:$0xff]  }
  0x68   :  { %1832 = vmatpush3.bf16.msra.mxu0 %v2034_v25  ;;  %v2093_v25 = vld [vmem:[#allocation5 + $0x438] sm:$0xff]  }
  0x69   :  { %1833 = vmatprep.subr.bf16.mxu0 %v2037_v28  ;;  %v2096_v28 = vld [vmem:[#allocation5 + $0x420] sm:$0xff]  }
  0x6a   :  { %1854 = vmatpush3.bf16.msra.mxu1 %v2036_v27  ;;  %v2095_v27 = vld [vmem:[#allocation5 + $0x428] sm:$0xff]  }
  0x6b   :  { %1855 = vmatprep.subr.bf16.mxu1 %v2039_v30  ;;  %v2098_v30 = vld [vmem:[#allocation5 + $0x410] sm:$0xff]  }
  0x6c   :  { %1834 = vmatpush3.bf16.msra.mxu0 %v2038_v29  ;;  %v2097_v29 = vld [vmem:[#allocation5 + $0x418] sm:$0xff]  }
  0x6d   :  { %1835 = vmatprep.subr.bf16.mxu0 %v2041_v32  ;;  %v2100_v32 = vld [vmem:[#allocation5 + $0x400] sm:$0xff]  }
  0x6e   :  { %1856 = vmatpush3.bf16.msra.mxu1 %v2040_v31  ;;  %v2099_v31 = vld [vmem:[#allocation5 + $0x408] sm:$0xff]  }
  0x6f   :  { %1857 = vmatprep.subr.bf16.mxu1 %v2043_v34 }
  0x70   :  { %1836 = vmatpush3.bf16.msra.mxu0 %v2042_v33  ;;  %v2101_v33 = vld [vmem:[#allocation2 + $0x40] ss:$0 sps:$4 sm:$0xff]  }
  0x71   :  { %1837 = vmatprep.subr.bf16.mxu0 %v2045_v36 }
  0x72   :  { %1858 = vmatpush3.bf16.msra.mxu1 %v2044_v35  ;;  %v1583_v35 = vld [vmem:[%s2209_s2] ss:$0 sm:$0xff]  ;;  %s2174_s2 = smov [#allocation7]  }
  0x73   :  { %1859 = vmatprep.subr.bf16.mxu1 %v2047_v38  ;;  %s1573_s24 = sshll.u32 %s2174_s2, 4  ;;  %s1574_s24 = int_to_ptr.vmem [resolvable:$true] %s1573_s24 }
  0x74   :  { %1838 = vmatpush3.bf16.msra.mxu0 %v2046_v37  ;;  %s2142_s25 = scalar_lea.vmem %s1574_s24, 128  ;;  %p2147_p11 = scmp.lt.s32.totalorder %s1574_s24, %s1574_s24 }
  0x75   :  { %1839 = vmatprep.subr.bf16.mxu0 %v2049_v40  ;;  %p2143_p10 = scmp.ne.s32.totalorder %s1574_s24, %s2142_s25  ;;  %p2148_p12 = scmp.lt.s32.totalorder %s2142_s25, %s2142_s25 }
  0x76   :  { %1860 = vmatpush3.bf16.msra.mxu1 %v2048_v39 }
  0x77   :  { %1861 = vmatprep.subr.bf16.mxu1 %v2051_v42  ;;  %p2149_p13 = por %p2148_p12, %p2147_p11 }
  0x78   :  { %1840 = vmatpush3.bf16.msra.mxu0 %v2050_v41 }
  0x79   :  { %1869 = vmatprep.subr.bf16.mxu0 %v2055_v47  ;;  %p2150_p0 = pnand %p2149_p13, %p2143_p10 }
  0x7a   :  { %1862 = vmatpush3.bf16.msra.mxu1 %v2054_v46 }
  0x7b   :  { %1399 = vmatmul.mubr.bf16.vlgmr.msra.gmra.mxu0 %v1592_v44  ;;  %1891 = vmatprep.subr.bf16.mxu1 %v2059_v52 }
  0x7c   :  { %1870 = vmatpush3.bf16.msra.mxu0 %v2058_v51  ;;  %1478 = vmatprep.mubr.bf16.mxu0 %v1597_v19 }
  0x7d   :  { %1439 = vmatmul.mubr.bf16.vlgmr.msra.gmra.mxu1 %v1594_v49  ;;  %1871 = vmatprep.subr.bf16.mxu0 %v2061_v54 }
  0x7e   :  { %1892 = vmatpush3.bf16.msra.mxu1 %v2060_v53  ;;  %1518 = vmatprep.mubr.bf16.mxu1 %v1599_v24 }
  0x7f   :  { %1893 = vmatprep.subr.bf16.mxu1 %v2063_v56 }
  0x80   :  { %1872 = vmatpush3.bf16.msra.mxu0 %v2062_v55 }
  0x81   :  { %1873 = vmatprep.subr.bf16.mxu0 %v2065_v58 }
  0x82   :  { %1894 = vmatpush3.bf16.msra.mxu1 %v2064_v57 }
  0x83   :  { %1895 = vmatprep.subr.bf16.mxu1 %v2067_v60 }
  0x84   :  { %1874 = vmatpush3.bf16.msra.mxu0 %v2066_v59 }
  0x85   :  { %1875 = vmatprep.subr.bf16.mxu0 %v2069_v62 }
  0x86   :  { %1896 = vmatpush3.bf16.msra.mxu1 %v2068_v61 }
  0x87   :  { %1897 = vmatprep.subr.bf16.mxu1 %v2071_v0 }
  0x88   :  { %1876 = vmatpush3.bf16.msra.mxu0 %v2070_v63 }
  0x89   :  { %1877 = vmatprep.subr.bf16.mxu0 %v2073_v2 }
  0x8a   :  { %1898 = vmatpush3.bf16.msra.mxu1 %v2072_v1 }
  0x8b   :  { %1899 = vmatprep.subr.bf16.mxu1 %v2075_v4 }
  0x8c   :  { %1878 = vmatpush3.bf16.msra.mxu0 %v2074_v3 }
  0x8d   :  { %1879 = vmatprep.subr.bf16.mxu0 %v2077_v6 }
  0x8e   :  { %1900 = vmatpush3.bf16.msra.mxu1 %v2076_v5 }
  0x8f   :  { %1901 = vmatprep.subr.bf16.mxu1 %v2079_v8 }
  0x90   :  { %1880 = vmatpush3.bf16.msra.mxu0 %v2078_v7 }
  0x91   :  { %1881 = vmatprep.subr.bf16.mxu0 %v2081_v10 }
  0x92   :  { %1902 = vmatpush3.bf16.msra.mxu1 %v2080_v9 }
  0x93   :  { %1903 = vmatprep.subr.bf16.mxu1 %v2083_v12 }
  0x94   :  { %1882 = vmatpush3.bf16.msra.mxu0 %v2082_v11 }
  0x95   :  { %1883 = vmatprep.subr.bf16.mxu0 %v2085_v14 }
  0x96   :  { %1904 = vmatpush3.bf16.msra.mxu1 %v2084_v13 }
  0x97   :  { %1905 = vmatprep.subr.bf16.mxu1 %v2087_v16 }
  0x98   :  { %1884 = vmatpush3.bf16.msra.mxu0 %v2086_v15 }
  0x99   :  { %1922 = vmatprep.subr.bf16.mxu0 %v2172_v21 }
  0x9a   :  { %1906 = vmatpush3.bf16.msra.mxu1 %v2090_v20 }
  0x9b   :  { %1479 = vmatmul.mubr.bf16.vlgmr.msra.gmra.mxu0 %v1596_v18 }
  0x9c   :  { %1923 = vmatpush3.bf16.msra.mxu0 %v2093_v25  ;;  %1938 = vmatprep.mubr.msk.bf16.mxu0 %vm2173_vm0, %v2172_v21 }
  0x9d   :  { %1519 = vmatmul.mubr.bf16.vlgmr.msra.gmra.mxu1 %v1598_v23  ;;  %1924 = vmatprep.subr.bf16.mxu0 %v2172_v21 }
  0xa0   :  { %1925 = vmatpush3.bf16.msra.mxu0 %v2094_v26 }
  0xa1   :  { %1926 = vmatprep.subr.bf16.mxu0 %v2172_v21 }
  0xa4   :  { %1927 = vmatpush3.bf16.msra.mxu0 %v2095_v27 }
  0xa5   :  { %1928 = vmatprep.subr.bf16.mxu0 %v2172_v21 }
  0xa8   :  { %1929 = vmatpush3.bf16.msra.mxu0 %v2096_v28 }
  0xa9   :  { %1930 = vmatprep.subr.bf16.mxu0 %v2172_v21 }
  0xac   :  { %1931 = vmatpush3.bf16.msra.mxu0 %v2097_v29 }
  0xad   :  { %1932 = vmatprep.subr.bf16.mxu0 %v2172_v21 }
  0xb0   :  { %1933 = vmatpush3.bf16.msra.mxu0 %v2098_v30 }
  0xb1   :  { %1934 = vmatprep.subr.bf16.mxu0 %v2172_v21 }
  0xb4   :  { %1935 = vmatpush3.bf16.msra.mxu0 %v2099_v31 }
  0xb5   :  { %1936 = vmatprep.subr.bf16.mxu0 %v2172_v21 }
  0xb8   :  { %1937 = vmatpush3.bf16.msra.mxu0 %v2100_v32 }
  0xbb   :  { %1939 = vmatmul.mubr.bf16.vlgmr.msra.gmra.mxu0 %v2101_v33 }
  0xfb   :  { %v1753_v34 = vpop.f32.mrf.mxu0 }
  0xfd   :  { %v1754_v36 = vpop.f32.mrf.mxu0  ;;  %v1775_v37 = vpop.f32.mrf.mxu1 }
  0xfe   :  { %v1755_v38 = vadd.f32 %v1754_v36, %v1753_v34 }
  0xff   :  { %v1756_v39 = vpop.f32.mrf.mxu0  ;;  %v1776_v40 = vpop.f32.mrf.mxu1 }
 0x100   :  { %v1241_v41 = vadd.f32 %v1755_v38, %v1583_v35  ;;  %v1777_v42 = vadd.f32 %v1776_v40, %v1775_v37 }
 0x101   :  { %v1757_v43 = vpop.f32.mrf.mxu0  ;;  %v1778_v44 = vpop.f32.mrf.mxu1 }
 0x102   :  { %v1281_v45 = vadd.f32 %v1777_v42, %v1241_v41 }
 0x103   :  { %v1779_v46 = vpop.f32.mrf.mxu1 }
 0x11b   :  { %v1797_v47 = vpop.f32.mrf.mxu0 }
 0x11d   :  { %v1798_v48 = vpop.f32.mrf.mxu0  ;;  %v1819_v50 = vpop.f32.mrf.mxu1 }
 0x11e   :  { %v1799_v49 = vadd.f32 %v1798_v48, %v1797_v47 }
 0x11f   :  { %v1800_v51 = vpop.f32.mrf.mxu0  ;;  %v1820_v53 = vpop.f32.mrf.mxu1 }
 0x120   :  { %v1321_v52 = vadd.f32 %v1799_v49, %v1281_v45  ;;  %v1821_v54 = vadd.f32 %v1820_v53, %v1819_v50 }
 0x121   :  { %v1801_v55 = vpop.f32.mrf.mxu0  ;;  %v1822_v56 = vpop.f32.mrf.mxu1 }
 0x122   :  { %v1361_v57 = vadd.f32 %v1821_v54, %v1321_v52 }
 0x123   :  { %v1823_v58 = vpop.f32.mrf.mxu1 }
 0x13b   :  { %v1841_v59 = vpop.f32.mrf.mxu0 }
 0x13d   :  { %v1842_v60 = vpop.f32.mrf.mxu0  ;;  %v1863_v61 = vpop.f32.mrf.mxu1 }
 0x13e   :  { %v1843_v11 = vadd.f32 %v1842_v60, %v1841_v59 }
 0x13f   :  { %v1844_v62 = vpop.f32.mrf.mxu0  ;;  %v1864_v63 = vpop.f32.mrf.mxu1 }
 0x140   :  { %v1401_v12 = vadd.f32 %v1843_v11, %v1361_v57  ;;  %v1865_v13 = vadd.f32 %v1864_v63, %v1863_v61 }
 0x141   :  { %v1845_v0 = vpop.f32.mrf.mxu0  ;;  %v1866_v1 = vpop.f32.mrf.mxu1 }
 0x142   :  { %v1441_v15 = vadd.f32 %v1865_v13, %v1401_v12 }
 0x143   :  { %v1867_v2 = vpop.f32.mrf.mxu1 }
 0x15b   :  { %v1885_v3 = vpop.f32.mrf.mxu0 }
 0x15d   :  { %v1886_v4 = vpop.f32.mrf.mxu0  ;;  %v1907_v5 = vpop.f32.mrf.mxu1 }
 0x15e   :  { %v1887_v14 = vadd.f32 %v1886_v4, %v1885_v3 }
 0x15f   :  { %v1888_v6 = vpop.f32.mrf.mxu0  ;;  %v1908_v7 = vpop.f32.mrf.mxu1 }
 0x160   :  { %v1481_v16 = vadd.f32 %v1887_v14, %v1441_v15  ;;  %v1909_v17 = vadd.f32 %v1908_v7, %v1907_v5 }
 0x161   :  { %v1889_v8 = vpop.f32.mrf.mxu0  ;;  %v1910_v9 = vpop.f32.mrf.mxu1 }
 0x162   :  { %v1521_v18 = vadd.f32 %v1909_v17, %v1481_v16 }
 0x163   :  { %v1911_v10 = vpop.f32.mrf.mxu1 }
 0x17b   :  { %v1560_v19 = vpop.f32.mrf.mxu0 }
 0x17c   :  { %v1561_v20 = vadd.f32 %v1560_v19, %v1521_v18 }
 0x17d   :  { %v1940_v21 = vpop.f32.mrf.mxu0 }
 0x17e   :  { %1566 = vst [vmem:[#allocation7] sm:$0xff] %v1561_v20 }
 0x17f   :  { %v1563_v22 = vpop.f32.mrf.mxu0 }
 0x180   :  { %2153 = shalt.err (!%p2150_p0)
}
 0x181   :  { %1576 = dma.vmem_to_hbm [thread:$0]  %s1574_s24, 128, %s2210_s3, [#allocation4]   ;;  %v1941_v23 = vpop.f32.mrf.mxu0 }
 0x182   :  { %2166 = dma.done.wait [#allocation4], 128  }
 0x183   :  { %2167 = vsyncadd [#allocation4], 4294967168 }
 0x184   :  { %1580 = vsyncpa [#allocation3], 1 }
 0x185   :  { %1581 = vsyncpa [#allocation6], 1 }
 0x186   :  { %1582 = vsyncpa [#allocation4], 1 }

</bundles_post_ra>
